<compile_context>
chip_gen: v5e
topology: v5e:2x2
jax: 0.10.0
libtpu: 0.0.40
codegen_flags: <defaults>
</compile_context>

<pallas_src>
import jax
import jax.numpy as jnp
from jax import lax
from jax.experimental import pallas as pl
from jax.experimental.pallas import tpu as pltpu


def _patch_embed_kernel(x_ref, w_ref, b_ref, o_ref):
    # x_ref: (TM, K)     bf16 patch rows (streamed, double-buffered)
    # w_ref: (E_pad, K)  bf16 conv weight (VMEM-resident, constant index_map)
    # b_ref: (1, E_pad)  f32 bias
    # o_ref: (TM, E_pad) output tile
    acc = lax.dot_general(
        x_ref[...], w_ref[...],
        dimension_numbers=(((1,), (1,)), ((), ())),   # contract K (w is (E, K))
        preferred_element_type=jnp.float32,
    )
    o_ref[...] = (acc + b_ref[...]).astype(o_ref.dtype)


def _round_up(a, m):
    return (a + m - 1) // m * m


def patch_embedding(x, weight, bias, patch_size, *, tm=512):
    """Forward pass of PatchEmbedding.

    Args:
      x:      (B, C, H, W) float32, NCHW like the PyTorch module.
      weight: (E, C, P, P) conv weight (PyTorch Conv2d layout).
      bias:   (E,) conv bias.
      patch_size: P (kernel_size == stride, no padding).
      tm:     target M-tile (patch rows per grid step), multiple of 8.

    Returns:
      (B, num_patches, E) float32 — matches flatten(conv(x)).permute(0, 2, 1).
    """
    B, C, H, W = x.shape
    E = weight.shape[0]
    P = patch_size
    assert H % P == 0 and W % P == 0, "image size must be divisible by patch size"
    nh, nw = H // P, W // P
    num_patches = nh * nw
    K = C * P * P
    M = B * num_patches

    # --- glue: extract non-overlapping patches, flatten in (c, ph, pw) order.
    # (B, C, nh, P, nw, P) -> (B, nh, nw, C, P, P) -> (M, K); cast to bf16 so
    # the dominant HBM stream (the patch matrix) is half-width.
    xp = x.reshape(B, C, nh, P, nw, P)
    xp = jnp.transpose(xp, (0, 2, 4, 1, 3, 5))
    patches = xp.reshape(M, K).astype(jnp.bfloat16)

    # --- tile sizing: big aligned TM when M is large, otherwise one 8-rounded
    #     step; pad M to a TM multiple, pad E to a lane-dense multiple of 128.
    TM = tm if M >= tm else _round_up(M, 8)
    M_pad = _round_up(M, TM)
    E_pad = _round_up(E, 128)

    if M_pad != M:
        patches = jnp.pad(patches, ((0, M_pad - M), (0, 0)))

    # Conv weight (E, C, P, P) -> (E, K) bf16 (no transpose); pad E if needed.
    w_mat = weight.reshape(E, K).astype(jnp.bfloat16)
    b_mat = bias.reshape(1, E).astype(jnp.float32)
    if E_pad != E:
        w_mat = jnp.pad(w_mat, ((0, E_pad - E), (0, 0)))
        b_mat = jnp.pad(b_mat, ((0, 0), (0, E_pad - E)))

    grid = (M_pad // TM,)

    cost = pl.CostEstimate(
        flops=2 * M_pad * K * E_pad,
        transcendentals=0,
        bytes_accessed=(M_pad * K * 2            # patches (bf16)
                        + E_pad * K * 2          # weight  (bf16)
                        + E_pad * 4              # bias    (f32)
                        + M_pad * E_pad * 4),    # output  (f32)
    )

    out = pl.pallas_call(
        _patch_embed_kernel,
        out_shape=jax.ShapeDtypeStruct((M_pad, E_pad), x.dtype),
        grid_spec=pltpu.PrefetchScalarGridSpec(
            num_scalar_prefetch=0,
            grid=grid,
            in_specs=[
                # streaming patch rows, double-buffered by the pipeline
                pl.BlockSpec((TM, K), lambda i: (i, 0)),
                # weight / bias: constant index_map -> stays VMEM-resident
                pl.BlockSpec((E_pad, K), lambda i: (0, 0)),
                pl.BlockSpec((1, E_pad), lambda i: (0, 0)),
            ],
            out_specs=pl.BlockSpec((TM, E_pad), lambda i: (i, 0)),
        ),
        compiler_params=pltpu.CompilerParams(
            dimension_semantics=("parallel",),     # shard M across TCs (v7x)
            vmem_limit_bytes=48 * 1024 * 1024,     # > v5e/v6e scoped default, < v7x 64 MiB
        ),
        cost_estimate=cost,
    )(patches, w_mat, b_mat)

    out = out[:M, :E]
    return out.reshape(B, num_patches, E)


if __name__ == "__main__":
    # Small shapes consistent with the module's forward.
    B, C, H, W = 2, 4, 16, 16
    P = 8            # patch_size
    E = 32           # embedding_dim

    key = jax.random.PRNGKey(0)
    kx, kw, kb = jax.random.split(key, 3)

    x = jax.random.normal(kx, (B, C, H, W), dtype=jnp.float32)
    # Deterministic synthetic params (Conv2d weight/bias shapes).
    weight = jax.random.normal(kw, (E, C, P, P), dtype=jnp.float32) * 0.02
    bias = jax.random.normal(kb, (E,), dtype=jnp.float32) * 0.02

    out = patch_embedding(x, weight, bias, P)
    out = jax.block_until_ready(out)
    assert out.shape == (B, (H // P) * (W // P), E), out.shape

    # Pure-JAX references.
    xp = jnp.transpose(x.reshape(B, C, H // P, P, W // P, P), (0, 2, 4, 1, 3, 5))
    patches_ref = xp.reshape(B, (H // P) * (W // P), C * P * P)
    w_flat = weight.reshape(E, -1)

    # (a) same bf16-input / f32-accumulate path as the kernel -> tight tolerance
    ref_bf16 = lax.dot_general(
        patches_ref.astype(jnp.bfloat16), w_flat.astype(jnp.bfloat16),
        dimension_numbers=(((2,), (1,)), ((), ())),
        preferred_element_type=jnp.float32,
    ) + bias
    assert jnp.allclose(out, ref_bf16, atol=2e-3, rtol=2e-3)

    # (b) full-f32 reference -> loose tolerance (bf16 input rounding)
    ref_f32 = jnp.einsum("bnk,ek->bne", patches_ref, w_flat) + bias
    assert jnp.allclose(out, ref_f32, atol=1e-2, rtol=1e-2)

    print("KERNEL_OK")
</pallas_src>

<mosaic_0001>
module attributes {stable_mosaic.version = 11 : i64} {
  func.func @_patch_embed_kernel(%arg0: i32, %arg1: memref<8x256xbf16, #tpu.memory_space<vmem>>, %arg2: memref<128x256xbf16, #tpu.memory_space<vmem>>, %arg3: memref<1x128xf32, #tpu.memory_space<vmem>>, %arg4: memref<8x128xf32, #tpu.memory_space<vmem>>) attributes {dimension_semantics = [#tpu.dimension_semantics<parallel>], iteration_bounds = array<i64: 1>, scalar_prefetch = 0 : i64, scratch_operands = 0 : i64, tpu.core_type = #tpu.core_type<tc>, window_params = [{transform_indices = @transform_0, window_bounds = array<i64: 8, 256>}, {pipeline_mode = #tpu.pipeline_mode<synchronous>, transform_indices = @transform_1, window_bounds = array<i64: 128, 256>}, {pipeline_mode = #tpu.pipeline_mode<synchronous>, transform_indices = @transform_2, window_bounds = array<i64: 1, 128>}, {transform_indices = @transform_3, window_bounds = array<i64: 8, 128>}]} {
    %c0 = arith.constant 0 : index
    %c0_0 = arith.constant 0 : index
    %0 = vector.load %arg1[%c0, %c0_0] : memref<8x256xbf16, #tpu.memory_space<vmem>>, vector<8x256xbf16>
    %c0_1 = arith.constant 0 : index
    %c0_2 = arith.constant 0 : index
    %1 = vector.load %arg2[%c0_1, %c0_2] : memref<128x256xbf16, #tpu.memory_space<vmem>>, vector<128x256xbf16>
    %cst = arith.constant dense<0.000000e+00> : vector<8x128xf32>
    %2 = tpu.matmul %0, %1, %cst {dimension_numbers = #tpu.dot_dimension_numbers<[1], [1], [0], [0], [0, 0, 1, 0], [], []>} : vector<8x256xbf16>, vector<128x256xbf16>, vector<8x128xf32> -> vector<8x128xf32>
    %c0_3 = arith.constant 0 : index
    %c0_4 = arith.constant 0 : index
    %3 = vector.load %arg3[%c0_3, %c0_4] : memref<1x128xf32, #tpu.memory_space<vmem>>, vector<1x128xf32>
    %4 = vector.broadcast %3 : vector<1x128xf32> to vector<8x128xf32>
    %5 = arith.addf %2, %4 : vector<8x128xf32>
    %c0_5 = arith.constant 0 : index
    %c0_6 = arith.constant 0 : index
    %6 = vector.load %arg4[%c0_5, %c0_6] : memref<8x128xf32, #tpu.memory_space<vmem>>, vector<8x128xf32>
    tpu.vector_store %arg4[%c0_5, %c0_6], %5 {strides = array<i32>} : memref<8x128xf32, #tpu.memory_space<vmem>>, vector<8x128xf32>,
    return
  }
  func.func @transform_0(%arg0: i32) -> (i32, i32) {
    %c0_i32 = arith.constant 0 : i32
    %c0_i32_0 = arith.constant 0 : i32
    return %arg0, %c0_i32 : i32, i32
  }
  func.func @transform_1(%arg0: i32) -> (i32, i32) {
    %c0_i32 = arith.constant 0 : i32
    %c0_i32_0 = arith.constant 0 : i32
    %c0_i32_1 = arith.constant 0 : i32
    return %c0_i32, %c0_i32_0 : i32, i32
  }
  func.func @transform_2(%arg0: i32) -> (i32, i32) {
    %c0_i32 = arith.constant 0 : i32
    %c0_i32_0 = arith.constant 0 : i32
    %c0_i32_1 = arith.constant 0 : i32
    return %c0_i32, %c0_i32_0 : i32, i32
  }
  func.func @transform_3(%arg0: i32) -> (i32, i32) {
    %c0_i32 = arith.constant 0 : i32
    %c0_i32_0 = arith.constant 0 : i32
    return %arg0, %c0_i32 : i32, i32
  }
}

</mosaic_0001>

<bundles_post_ra>
// kernel: tpu_custom_call.1
= control target key start
LH: loop header
LB: loop body
LE: loop exit
PB: predicated region body
PF: predicated region fallthrough
CT: control target
= control target key end

     0   :  { %8 = vsyncpa [#allocation3], 0  ;;  %s399_s0 = inlined_call_operand.hbm [shape: bf16[8,256], index: 0, kind: input, shape index: {}]   ;;  %s400_s1 = inlined_call_operand.hbm [shape: bf16[128,256], index: 1, kind: input, shape index: {}]   ;;  %s401_s2 = inlined_call_operand.vmem [shape: f32[1,128], index: 2, kind: input, shape index: {}]   ;;  %s402_s3 = inlined_call_operand.hbm [shape: f32[8,128], index: 3, kind: output, shape index: {}]  }
   0x1   :  { %9 = vsyncpa [#allocation6], 0 }
   0x2   :  { %10 = vsyncpa [#allocation4], 0  ;;  %s16_s14 = sshll.u32 %s399_s0, 4  ;;  %s362_s15 = smov [#allocation2]   ;;  %s17_s14 = int_to_ptr.hbm [resolvable:$true] %s16_s14 }
   0x3   :  { %s18_s16 = sshll.u32 %s362_s15, 4  ;;  %s26_s19 = sshll.u32 %s400_s1, 4  ;;  %s19_s16 = int_to_ptr.vmem [resolvable:$true] %s18_s16  ;;  %s27_s19 = int_to_ptr.hbm [resolvable:$true] %s26_s19 }
   0x4   :  { %21 = dma.hbm_to_vmem [thread:$0]  %s17_s14, 128, %s19_s16, [#allocation3]  }
   0x5   :  { %s363_s20 = smov [#allocation5]   ;;  %s364_s22 = smov 128  }
   0x6   :  { %s28_s21 = sshll.u32 %s363_s20, 4  ;;  %s365_s23 = smov 8   ;;  %s29_s21 = int_to_ptr.vmem [resolvable:$true] %s28_s21 }
   0x7   :  { %34 = dma.hbm_to_vmem [thread:$0]  %s27_s19, 2048, %s29_s21, [#allocation6], %s364_s22, %s364_s22, %s365_s23  }
   0x8   :  { %356 = dma.done.wait [#allocation3], 128  }
   0x9   :  { %357 = vsyncadd [#allocation3], 4294967168 }
   0xa   :  { %358 = dma.done.wait [#allocation6], 2048  }
   0xb   :  { %359 = vsyncadd [#allocation6], 4294965248  ;;  %v256_v0 = vld [vmem:[#allocation5 + $0x70] sm:$0xf]  ;;  %v277_v1 = vld [vmem:[#allocation5 + $0x74] sm:$0xf0] }
   0xc   :  { %v276_v2 = vld [vmem:[#allocation5 + $0x74] sm:$0xf]  ;;  %v257_v3 = vor.u32 %v277_v1, %v256_v0  ;;  %v258_v4 = vld [vmem:[#allocation5 + $0x78] sm:$0xf0]  ;;  %v248_v6 = vld [vmem:[#allocation5 + $0x60] sm:$0xf] }
   0xd   :  { %v261_v5 = vor.u32 %v276_v2, %v258_v4  ;;  %v275_v7 = vld [vmem:[#allocation5 + $0x64] sm:$0xf0]  ;;  %v274_v8 = vld [vmem:[#allocation5 + $0x64] sm:$0xf]  ;;  %v250_v9 = vld [vmem:[#allocation5 + $0x68] sm:$0xf0] }
   0xe   :  { %153 = vmatpush.bf16.xpose.msra.mxu0 %v257_v3  ;;  %v249_v10 = vor.u32 %v275_v7, %v248_v6  ;;  %v253_v11 = vor.u32 %v274_v8, %v250_v9  ;;  %v240_v12 = vld [vmem:[#allocation5 + $0x50] sm:$0xf]  ;;  %v273_v13 = vld [vmem:[#allocation5 + $0x54] sm:$0xf0]  ;;  %v272_v14 = vld [vmem:[#allocation5 + $0x54] sm:$0xf] }
   0xf   :  { %166 = vmatpush.bf16.xpose.msra.mxu1 %v261_v5  ;;  %v242_v15 = vld [vmem:[#allocation5 + $0x58] sm:$0xf0]  ;;  %v241_v16 = vor.u32 %v273_v13, %v240_v12  ;;  %v232_v18 = vld [vmem:[#allocation5 + $0x40] sm:$0xf]  ;;  %v271_v19 = vld [vmem:[#allocation5 + $0x44] sm:$0xf0] }
  0x10   :  { %v245_v17 = vor.u32 %v272_v14, %v242_v15  ;;  %v270_v20 = vld [vmem:[#allocation5 + $0x44] sm:$0xf]  ;;  %v234_v21 = vld [vmem:[#allocation5 + $0x48] sm:$0xf0]  ;;  %v233_v22 = vor.u32 %v271_v19, %v232_v18  ;;  %v224_v24 = vld [vmem:[#allocation5 + $0x30] sm:$0xf] }
  0x11   :  { %v237_v23 = vor.u32 %v270_v20, %v234_v21  ;;  %v269_v25 = vld [vmem:[#allocation5 + $0x34] sm:$0xf0]  ;;  %v268_v26 = vld [vmem:[#allocation5 + $0x34] sm:$0xf]  ;;  %v226_v27 = vld [vmem:[#allocation5 + $0x38] sm:$0xf0] }
  0x12   :  { %v225_v28 = vor.u32 %v269_v25, %v224_v24  ;;  %v229_v29 = vor.u32 %v268_v26, %v226_v27  ;;  %v216_v30 = vld [vmem:[#allocation5 + $0x20] sm:$0xf]  ;;  %v267_v31 = vld [vmem:[#allocation5 + $0x24] sm:$0xf0]  ;;  %v266_v32 = vld [vmem:[#allocation5 + $0x24] sm:$0xf] }
  0x13   :  { %v218_v33 = vld [vmem:[#allocation5 + $0x28] sm:$0xf0]  ;;  %v217_v34 = vor.u32 %v267_v31, %v216_v30  ;;  %v208_v36 = vld [vmem:[#allocation5 + $0x10] sm:$0xf]  ;;  %v265_v37 = vld [vmem:[#allocation5 + $0x14] sm:$0xf0] }
  0x14   :  { %v221_v35 = vor.u32 %v266_v32, %v218_v33  ;;  %v264_v38 = vld [vmem:[#allocation5 + $0x14] sm:$0xf]  ;;  %v210_v39 = vld [vmem:[#allocation5 + $0x18] sm:$0xf0]  ;;  %v209_v40 = vor.u32 %v265_v37, %v208_v36  ;;  %v200_v42 = vld [vmem:[#allocation5] sm:$0xf] }
  0x15   :  { %v213_v41 = vor.u32 %v264_v38, %v210_v39  ;;  %v263_v43 = vld [vmem:[#allocation5 + $0x4] sm:$0xf0]  ;;  %v262_v44 = vld [vmem:[#allocation5 + $0x4] sm:$0xf]  ;;  %v202_v45 = vld [vmem:[#allocation5 + $0x8] sm:$0xf0] }
  0x16   :  { %154 = vmatpush.bf16.xpose.msra.mxu0 %v249_v10  ;;  %v201_v46 = vor.u32 %v263_v43, %v200_v42  ;;  %v45_v47 = vld [vmem:[#allocation2] sm:$0xff]  ;;  %v205_v48 = vor.u32 %v262_v44, %v202_v45  ;;  %s366_s24 = smov [#allocation7]   ;;  %s187_s28 = sshll.u32 %s402_s3, 4  ;;  %s188_s28 = int_to_ptr.hbm [resolvable:$true] %s187_s28 }
  0x17   :  { %167 = vmatpush.bf16.xpose.msra.mxu1 %v253_v11  ;;  %v67_v49 = vunpack.c.l.b16 %v45_v47  ;;  %v68_v50 = vunpack.c.h.b16 %v45_v47  ;;  %v283_v53 = vld [vmem:[%s401_s2] ss:$0 sm:$0xff]  ;;  %s185_s25 = sshll.u32 %s366_s24, 4  ;;  %s186_s25 = int_to_ptr.vmem [resolvable:$true] %s185_s25 }
  0x19   :  { %v69_v51 = vpack.c.b16 %v67_v49, %v67_v49  ;;  %v70_v52 = vpack.c.b16 %v68_v50, %v68_v50 }
  0x1e   :  { %155 = vmatpush.bf16.xpose.msra.mxu0 %v241_v16 }
  0x1f   :  { %168 = vmatpush.bf16.xpose.msra.mxu1 %v245_v17 }
  0x26   :  { %156 = vmatpush.bf16.xpose.msra.mxu0 %v233_v22 }
  0x27   :  { %169 = vmatpush.bf16.xpose.msra.mxu1 %v237_v23 }
  0x2e   :  { %157 = vmatpush.bf16.xpose.msra.mxu0 %v225_v28 }
  0x2f   :  { %170 = vmatpush.bf16.xpose.msra.mxu1 %v229_v29 }
  0x36   :  { %158 = vmatpush.bf16.xpose.msra.mxu0 %v217_v34 }
  0x37   :  { %171 = vmatpush.bf16.xpose.msra.mxu1 %v221_v35 }
  0x3e   :  { %159 = vmatpush.bf16.xpose.msra.mxu0 %v209_v40 }
  0x3f   :  { %172 = vmatpush.bf16.xpose.msra.mxu1 %v213_v41 }
  0x46   :  { %160 = vmatpush.bf16.xpose.msra.mxu0 %v201_v46 }
  0x47   :  { %173 = vmatpush.bf16.xpose.msra.mxu1 %v205_v48 }
  0x4d   :  { %161 = vmatmul.bf16.vlgmr.msra.gmra.mxu0 %v69_v51 }
  0x4e   :  { %174 = vmatmul.bf16.vlgmr.msra.gmra.mxu1 %v70_v52 }
  0xca   :  { %v162_v54 = vpop.f32.mrf.mxu0 }
  0xcb   :  { %v163_v55 = vadd.f32 %v283_v53, %v162_v54  ;;  %v175_v56 = vpop.f32.mrf.mxu1 }
  0xcd   :  { %v176_v57 = vadd.f32 %v175_v56, %v163_v55 }
  0xcf   :  { %179 = vst [vmem:[#allocation7] sm:$0xff] %v176_v57 }
  0xd0   :  { %190 = dma.vmem_to_hbm [thread:$0]  %s186_s25, 128, %s188_s28, [#allocation4]  }
  0xd2   :  { %v164_v58 = vpop.f32.mrf.mxu0 }
  0xd3   :  { %v177_v59 = vpop.f32.mrf.mxu1 }
  0xd4   :  { %360 = dma.done.wait [#allocation4], 128  }
  0xd5   :  { %361 = vsyncadd [#allocation4], 4294967168 }
  0xd6   :  { %195 = vsyncpa [#allocation3], 1 }
  0xd7   :  { %196 = vsyncpa [#allocation6], 1 }
  0xd8   :  { %197 = vsyncpa [#allocation4], 1 }

</bundles_post_ra>
